<compile_context>
chip_gen: v6e
topology: v6e:2x2x1
jax: 0.10.0
libtpu: 0.0.40
codegen_flags: <defaults>
</compile_context>

<pallas_src>
from functools import partial

import jax
import jax.numpy as jnp
from jax.experimental import pallas as pl
from jax.experimental.pallas import tpu as pltpu


VMEM_LIMIT = 32 * 1024 * 1024   # fits comfortably on v5e / v6e / v7x with the tile sizes below
GROUPS = 32                     # GroupNormAct groups (timm default)
LANE = 128                      # channel padding granularity (vreg lane width)


def _cparams(dims):
    return pltpu.CompilerParams(dimension_semantics=dims, vmem_limit_bytes=VMEM_LIMIT)


def _round_up(x, m):
    return ((x + m - 1) // m) * m


def _pick_row_tile(M):
    for t in (256, 128, 64, 32, 16, 8):
        if M % t == 0:
            return t, M
    Mp = _round_up(M, 8)
    return Mp, Mp


def _same_pad_amount(size, k, s):
    return max((-(-size // s) - 1) * s + k - size, 0)


# ----------------------------------------------------------------------------
# Pallas kernels
# ----------------------------------------------------------------------------

def _ws_kernel(w_ref, o_ref, *, eps):
    """Weight standardization per output channel (over fan-in axis 0), biased variance, f32."""
    w = w_ref[...]
    mu = jnp.mean(w, axis=0, keepdims=True)
    var = jnp.mean(jnp.square(w - mu), axis=0, keepdims=True)
    o_ref[...] = (w - mu) * jax.lax.rsqrt(var + eps)


def _matmul_kernel(p_ref, w_ref, o_ref):
    """One (row-tile, out-channel-tile) bf16 MXU matmul with f32 accumulation, bf16 store."""
    o_ref[...] = jnp.dot(p_ref[...], w_ref[...],
                         preferred_element_type=jnp.float32).astype(o_ref.dtype)


def _conv_taps_kernel(x_ref, w_ref, o_ref, *, taps, Ho, Wo, C):
    """One (batch, out-channel-tile) step: accumulate the kh*kw tap matmuls from the
    VMEM-resident phase-decimated input.

    x_ref: (n_par, Hd, Wd, C) bf16 (phase p holds rows p, p+s, ... of the padded input)
    w_ref: (kh*kw*C, to)     bf16 standardized weights, tap-major
    o_ref: (1, Ho*Wo, to)    bf16
    """
    acc = None
    for (p, r, c, wrow) in taps:                         # static Python unroll
        tap = x_ref[p, pl.ds(r, Ho), pl.ds(c, Wo), :].reshape(Ho * Wo, C)
        contrib = jnp.dot(tap, w_ref[pl.ds(wrow, C), :],
                          preferred_element_type=jnp.float32)
        acc = contrib if acc is None else acc + contrib
    o_ref[0] = acc.astype(o_ref.dtype)


def _gn_kernel(*refs, eps, apply_act, denom, has_res):
    """GroupNorm over (spatial, channels-in-group) for one sample; optional fused residual+ReLU.
    Input/residual/output are bf16; statistics are f32.  Padded channels stay exactly zero
    (their membership column, gamma and beta are zero)."""
    if has_res:
        x_ref, sb_ref, m_ref, mt_ref, res_ref, o_ref = refs
    else:
        x_ref, sb_ref, m_ref, mt_ref, o_ref = refs
    x = x_ref[0].astype(jnp.float32)                                    # (HW, C)
    sums = jnp.concatenate([jnp.sum(x, axis=0, keepdims=True),
                            jnp.sum(x * x, axis=0, keepdims=True)], axis=0)   # (2, C)
    sg = jnp.dot(sums, m_ref[...], preferred_element_type=jnp.float32)        # (2, G)
    mean_g = sg[0:1, :] / denom
    var_g = sg[1:2, :] / denom - mean_g * mean_g
    inv_g = jax.lax.rsqrt(var_g + eps)
    stat_c = jnp.dot(jnp.concatenate([mean_g, inv_g], axis=0), mt_ref[...],
                     preferred_element_type=jnp.float32)                      # (2, C)
    y = (x - stat_c[0:1, :]) * stat_c[1:2, :] * sb_ref[0:1, :] + sb_ref[1:2, :]
    if has_res:
        y = y + res_ref[0].astype(jnp.float32)
    if apply_act:
        y = jnp.maximum(y, 0.0)
    o_ref[0] = y.astype(o_ref.dtype)


def _maxpool_kernel(x_ref, o_ref, *, taps, Ho, Wo):
    """Running max over the k*k taps of the phase-decimated, -inf padded input (one sample)."""
    acc = None
    for (p, r, c) in taps:
        v = x_ref[p, pl.ds(r, Ho), pl.ds(c, Wo), :]
        acc = v if acc is None else jnp.maximum(acc, v)
    o_ref[0] = acc


# ----------------------------------------------------------------------------
# Padding / phase-decimation helpers (wrapper-side, single pass)
# ----------------------------------------------------------------------------

def _pad_and_decimate(x, kh, kw, s, pad_value):
    """TF-SAME pad, then split into s*s phase grids so every conv/pool tap is a contiguous
    (Ho, Wo) window of one phase.  Returns (xd, n_par, Ho, Wo, Hd, Wd) with xd shaped
    (B * n_par, Hd, Wd, C) and xd[b*n_par + p*s + q, r, c] == padded[b, s*r + p, s*c + q].
    For s == 1 this is just the padded input (no data movement beyond the pad)."""
    B, H, W, C = x.shape
    ph = _same_pad_amount(H, kh, s)
    pw = _same_pad_amount(W, kw, s)
    Ho = (H + ph - kh) // s + 1
    Wo = (W + pw - kw) // s + 1
    Hd = Ho + (kh - 1) // s
    Wd = Wo + (kw - 1) // s
    top, left = ph // 2, pw // 2
    bottom = s * Hd - H - top          # >= the SAME back-pad; extra rows are never read
    right = s * Wd - W - left
    xp = jnp.pad(x, ((0, 0), (top, bottom), (left, right), (0, 0)),
                 constant_values=pad_value)
    if s == 1:
        return xp, 1, Ho, Wo, Hd, Wd
    xd = xp.reshape(B, Hd, s, Wd, s, C).transpose(0, 2, 4, 1, 3, 5)
    return xd.reshape(B * s * s, Hd, Wd, C), s * s, Ho, Wo, Hd, Wd


# ----------------------------------------------------------------------------
# Op wrappers
# ----------------------------------------------------------------------------

def conv_forward(x, cv):
    """Weight-standardized SAME conv.  x: (B,H,W,Cin_pad) bf16 -> (B,Ho,Wo,O_pad) bf16."""
    if cv['path'] == 'im2col':
        return _conv_im2col(x, cv)
    return _conv_taps(x, cv)


def _conv_taps(x, cv):
    """In-kernel tap accumulation path (all 1x1 and 3x3 convs; input read from HBM once)."""
    kh, kw, s = cv['kh'], cv['kw'], cv['stride']
    K, O_pad = cv['w'].shape
    C = cv['c_pad']
    assert x.shape[-1] == C
    if kh == 1 and kw == 1 and s > 1:
        x = x[:, ::s, ::s, :]          # strided 1x1: decimate once, then treat as stride 1
        s = 1
    B = x.shape[0]
    xd, n_par, Ho, Wo, Hd, Wd = _pad_and_decimate(x, kh, kw, s, 0.0)
    taps = [((i % s) * s + (j % s), i // s, j // s, (i * kw + j) * C)
            for i in range(kh) for j in range(kw)]
    to = 256 if O_pad % 256 == 0 else 128
    M1 = Ho * Wo
    cost = pl.CostEstimate(flops=2 * B * M1 * K * O_pad, transcendentals=0,
                           bytes_accessed=int(xd.size) * 2 + int(cv['w'].size) * 2 * B
                           + B * M1 * O_pad * 2)
    out = pl.pallas_call(
        partial(_conv_taps_kernel, taps=taps, Ho=Ho, Wo=Wo, C=C),
        out_shape=jax.ShapeDtypeStruct((B, M1, O_pad), jnp.bfloat16),
        grid=(B, O_pad // to),
        in_specs=[pl.BlockSpec((n_par, Hd, Wd, C), lambda b, jo: (b, 0, 0, 0)),
                  pl.BlockSpec((K, to), lambda b, jo: (0, jo))],
        out_specs=pl.BlockSpec((1, M1, to), lambda b, jo: (b, 0, jo)),
        compiler_params=_cparams(("parallel", "parallel")),
        cost_estimate=cost,
    )(xd, cv['w'])
    return out.reshape(B, Ho, Wo, O_pad)


def _conv_im2col(x, cv):
    """im2col matmul path (stem only: 3 input channels, so duplication is negligible and the
    flattened K=147 (padded to 256) feeds the MXU far better than 49 K=3 taps)."""
    kh, kw, s = cv['kh'], cv['kw'], cv['stride']
    K_real = cv['k_real']
    K_pad, O_pad = cv['w'].shape
    B, H, W, _ = x.shape
    ph = _same_pad_amount(H, kh, s)
    pw = _same_pad_amount(W, kw, s)
    xp = jnp.pad(x, ((0, 0), (ph // 2, ph - ph // 2), (pw // 2, pw - pw // 2), (0, 0)))
    Hp, Wp = xp.shape[1], xp.shape[2]
    Ho = (Hp - kh) // s + 1
    Wo = (Wp - kw) // s + 1
    cols = [xp[:, i:i + s * Ho:s, j:j + s * Wo:s, :] for i in range(kh) for j in range(kw)]
    patches = jnp.stack(cols, axis=3).reshape(B * Ho * Wo, K_real).astype(jnp.bfloat16)
    if K_pad > K_real:
        patches = jnp.pad(patches, ((0, 0), (0, K_pad - K_real)))   # dense 128-lane K
    M = B * Ho * Wo
    tm, Mp = _pick_row_tile(M)
    if Mp != M:
        patches = jnp.pad(patches, ((0, Mp - M), (0, 0)))
    to = 128 if O_pad % 256 else 256
    cost = pl.CostEstimate(flops=2 * Mp * K_pad * O_pad, transcendentals=0,
                           bytes_accessed=Mp * K_pad * 2 + K_pad * O_pad * 2 * (Mp // tm)
                           + Mp * O_pad * 2)
    out = pl.pallas_call(
        _matmul_kernel,
        out_shape=jax.ShapeDtypeStruct((Mp, O_pad), jnp.bfloat16),
        grid=(Mp // tm, O_pad // to),
        in_specs=[pl.BlockSpec((tm, K_pad), lambda i, j: (i, 0)),
                  pl.BlockSpec((K_pad, to), lambda i, j: (0, j))],
        out_specs=pl.BlockSpec((tm, to), lambda i, j: (i, j)),
        compiler_params=_cparams(("parallel", "parallel")),
        cost_estimate=cost,
    )(patches, cv['w'])
    return out[:M].reshape(B, Ho, Wo, O_pad)


def group_norm_act(x, nrm, *, apply_act=True, residual=None, eps=1e-5):
    """GroupNormAct; optionally fuses relu(gn(x) + residual) (bottleneck epilogue).
    x / residual / output are bf16 NHWC with the channel axis padded to a multiple of 128."""
    B, H, W, C = x.shape
    HW = H * W
    inputs = [x.reshape(B, HW, C), nrm['scale_bias'], nrm['member'], nrm['member_t']]
    in_specs = [pl.BlockSpec((1, HW, C), lambda b: (b, 0, 0)),
                pl.BlockSpec((2, C), lambda b: (0, 0)),
                pl.BlockSpec((C, GROUPS), lambda b: (0, 0)),
                pl.BlockSpec((GROUPS, C), lambda b: (0, 0))]
    has_res = residual is not None
    if has_res:
        inputs.append(residual.reshape(B, HW, C))
        in_specs.append(pl.BlockSpec((1, HW, C), lambda b: (b, 0, 0)))
    # TODO(synk): for real image resolutions add an HW grid axis with partial-sum scratch so each
    # block stays small on v7x's 64 MiB VMEM; at these shapes one sample per step is tiny.
    out = pl.pallas_call(
        partial(_gn_kernel, eps=eps, apply_act=apply_act,
                denom=float(HW * nrm['cg']), has_res=has_res),
        out_shape=jax.ShapeDtypeStruct((B, HW, C), jnp.bfloat16),
        grid=(B,),
        in_specs=in_specs,
        out_specs=pl.BlockSpec((1, HW, C), lambda b: (b, 0, 0)),
        compiler_params=_cparams(("parallel",)),
    )(*inputs)
    return out.reshape(B, H, W, C)


def max_pool_same(x, k=3, s=2):
    """MaxPool2dSame: TF-SAME -inf padding, k x k stride-s max pool.  Reads the input once."""
    B, H, W, C = x.shape
    xd, n_par, Ho, Wo, Hd, Wd = _pad_and_decimate(x, k, k, s, -jnp.inf)
    taps = [((i % s) * s + (j % s), i // s, j // s) for i in range(k) for j in range(k)]
    return pl.pallas_call(
        partial(_maxpool_kernel, taps=taps, Ho=Ho, Wo=Wo),
        out_shape=jax.ShapeDtypeStruct((B, Ho, Wo, C), x.dtype),
        grid=(B,),
        in_specs=[pl.BlockSpec((n_par, Hd, Wd, C), lambda b: (b, 0, 0, 0))],
        out_specs=pl.BlockSpec((1, Ho, Wo, C), lambda b: (b, 0, 0, 0)),
        compiler_params=_cparams(("parallel",)),
    )(xd)


# ----------------------------------------------------------------------------
# Parameters: raw init (mirrors timm ResNetV2 (3,4,9), preact=False, stem='same')
# and one-time preparation (weight standardization, padding, bf16 cast).
# ----------------------------------------------------------------------------

def _conv_init(key, out_c, in_c, kh, kw):
    return 0.05 * jax.random.normal(key, (out_c, in_c, kh, kw), dtype=jnp.float32)


def _norm_init(key, c):
    k1, k2 = jax.random.split(key)
    gamma = 1.0 + 0.1 * jax.random.normal(k1, (c,), dtype=jnp.float32)
    beta = 0.1 * jax.random.normal(k2, (c,), dtype=jnp.float32)
    return gamma, beta


def make_params(key, in_chans=3, layers=(3, 4, 9),
                channels=(256, 512, 1024, 2048), stem_chs=64):
    keys = iter(jax.random.split(key, 512))
    stem_gamma, stem_beta = _norm_init(next(keys), stem_chs)
    params = {'stem': {'conv_w': _conv_init(next(keys), stem_chs, in_chans, 7, 7),
                       'gamma': stem_gamma, 'beta': stem_beta}}
    stages = []
    prev_c = stem_chs
    for si, (out_c, depth) in enumerate(zip(channels, layers)):
        mid_c = out_c // 4                    # bottle_ratio = 0.25
        stage_stride = 1 if si == 0 else 2
        blocks = []
        for bi in range(depth):
            in_c = prev_c if bi == 0 else out_c
            stride = stage_stride if bi == 0 else 1
            blk = {'stride': stride}
            if in_c != out_c or stride != 1:  # DownsampleConv (1x1 + GN, no act)
                g, b = _norm_init(next(keys), out_c)
                blk['downsample'] = {'conv_w': _conv_init(next(keys), out_c, in_c, 1, 1),
                                     'gamma': g, 'beta': b}
            else:
                blk['downsample'] = None
            blk['conv1_w'] = _conv_init(next(keys), mid_c, in_c, 1, 1)
            blk['gamma1'], blk['beta1'] = _norm_init(next(keys), mid_c)
            blk['conv2_w'] = _conv_init(next(keys), mid_c, mid_c, 3, 3)
            blk['gamma2'], blk['beta2'] = _norm_init(next(keys), mid_c)
            blk['conv3_w'] = _conv_init(next(keys), out_c, mid_c, 1, 1)
            blk['gamma3'], blk['beta3'] = _norm_init(next(keys), out_c)
            blocks.append(blk)
        stages.append({'blocks': blocks})
        prev_c = out_c
    params['stages'] = stages
    return params


def _standardize_weight(w2, eps=1e-8):
    """(K, O) f32 -> standardized (K, O) f32 (one tiny Pallas call at setup time)."""
    return pl.pallas_call(
        partial(_ws_kernel, eps=eps),
        out_shape=jax.ShapeDtypeStruct(w2.shape, jnp.float32),
    )(w2)


def _prep_conv(weight, stride, path='taps', ws_eps=1e-8):
    """One-time: transpose to (K,O), standardize (eps=1e-8, as the Embedder configures),
    zero-pad channels to multiples of 128, cast to bf16."""
    O, I, kh, kw = map(int, weight.shape)
    w2 = jnp.transpose(weight, (2, 3, 1, 0)).reshape(kh * kw * I, O)
    w_std = _standardize_weight(w2, ws_eps)
    O_pad = _round_up(O, LANE)
    if path == 'im2col':
        K_real = kh * kw * I
        K_pad = _round_up(K_real, LANE)
        w_p = jnp.pad(w_std, ((0, K_pad - K_real), (0, O_pad - O)))
        return {'path': 'im2col', 'w': w_p.astype(jnp.bfloat16), 'kh': kh, 'kw': kw,
                'stride': stride, 'k_real': K_real, 'o_real': O}
    C_pad = _round_up(I, LANE)
    w4 = jnp.pad(w_std.reshape(kh, kw, I, O),
                 ((0, 0), (0, 0), (0, C_pad - I), (0, O_pad - O)))
    return {'path': 'taps', 'w': w4.reshape(kh * kw * C_pad, O_pad).astype(jnp.bfloat16),
            'kh': kh, 'kw': kw, 'stride': stride, 'c_pad': C_pad, 'o_real': O}


def _prep_norm(gamma, beta):
    C = int(gamma.shape[0])
    C_pad = _round_up(C, LANE)
    cg = C // GROUPS
    sb = jnp.stack([jnp.pad(gamma, (0, C_pad - C)), jnp.pad(beta, (0, C_pad - C))], axis=0)
    ch = jnp.arange(C_pad)
    member = ((ch[:, None] // cg == jnp.arange(GROUPS)[None, :]) & (ch[:, None] < C)
              ).astype(jnp.float32)                      # padded channels belong to no group
    return {'scale_bias': sb, 'member': member, 'member_t': member.T, 'cg': cg}


def prepare_params(params):
    prep = {'stem': {'conv': _prep_conv(params['stem']['conv_w'], 2, path='im2col'),
                     'norm': _prep_norm(params['stem']['gamma'], params['stem']['beta'])}}
    stages = []
    for stage in params['stages']:
        blocks = []
        for blk in stage['blocks']:
            bp = {}
            if blk['downsample'] is not None:
                bp['downsample'] = {
                    'conv': _prep_conv(blk['downsample']['conv_w'], blk['stride'], 'taps'),
                    'norm': _prep_norm(blk['downsample']['gamma'], blk['downsample']['beta'])}
            else:
                bp['downsample'] = None
            bp['conv1'] = _prep_conv(blk['conv1_w'], 1, 'taps')
            bp['norm1'] = _prep_norm(blk['gamma1'], blk['beta1'])
            bp['conv2'] = _prep_conv(blk['conv2_w'], blk['stride'], 'taps')
            bp['norm2'] = _prep_norm(blk['gamma2'], blk['beta2'])
            bp['conv3'] = _prep_conv(blk['conv3_w'], 1, 'taps')
            bp['norm3'] = _prep_norm(blk['gamma3'], blk['beta3'])
            blocks.append(bp)
        stages.append(blocks)
    prep['stages'] = stages
    return prep


# ----------------------------------------------------------------------------
# Forward
# ----------------------------------------------------------------------------

def bottleneck(x, bp):
    """timm resnetv2.Bottleneck (preact=False): conv-norm x3, residual add + ReLU (fused)."""
    shortcut = x
    if bp['downsample'] is not None:
        s = conv_forward(x, bp['downsample']['conv'])
        shortcut = group_norm_act(s, bp['downsample']['norm'], apply_act=False)
    y = conv_forward(x, bp['conv1'])
    y = group_norm_act(y, bp['norm1'])
    y = conv_forward(y, bp['conv2'])
    y = group_norm_act(y, bp['norm2'])
    y = conv_forward(y, bp['conv3'])
    # norm3 has apply_act=False in timm; the ReLU runs after the residual add.  Here
    # gn3 + residual-add + ReLU are one Pallas kernel.
    y = group_norm_act(y, bp['norm3'], apply_act=True, residual=shortcut)
    return y


def embedder_forward(prep, x_nchw, layer_out=(0, 1)):
    """Embedder.forward: stem -> stages, collecting stage outputs per layer_out."""
    x = jnp.transpose(x_nchw, (0, 2, 3, 1)).astype(jnp.bfloat16)   # NCHW f32 -> NHWC bf16
    # stem: StdConv2dSame 7x7/s2 -> GroupNormAct -> MaxPool2dSame 3x3/s2
    x = conv_forward(x, prep['stem']['conv'])
    x = group_norm_act(x, prep['stem']['norm'])
    x = max_pool_same(x, 3, 2)

    outputs = []
    n_stage = len(prep['stages'])
    for i, blocks in enumerate(prep['stages']):
        for bp in blocks:
            x = bottleneck(x, bp)
        if i in layer_out:
            outputs.append(x)
    if (n_stage - 1) not in layer_out:
        outputs.append(x)
    # return NCHW f32 like PyTorch (stage channel counts are already multiples of 128)
    return [jnp.transpose(o, (0, 3, 1, 2)).astype(jnp.float32) for o in outputs]


# ----------------------------------------------------------------------------

if __name__ == "__main__":
    key = jax.random.PRNGKey(0)
    pkey, xkey = jax.random.split(key)
    params = make_params(pkey, in_chans=3, layers=(3, 4, 9))
    prep = prepare_params(params)
    # small input: batch=2, 3 channels, 32x32 spatial (NCHW like PyTorch)
    x = jax.random.normal(xkey, (2, 3, 32, 32), dtype=jnp.float32)

    outs = embedder_forward(prep, x)      # [(2,256,8,8), (2,512,4,4), (2,1024,2,2)]
    for o in outs:
        jax.block_until_ready(o)
    assert outs[0].shape == (2, 256, 8, 8)
    assert outs[1].shape == (2, 512, 4, 4)
    assert outs[2].shape == (2, 1024, 2, 2)
    print("KERNEL_OK")
</pallas_src>

<mosaic_0001>
module attributes {stable_mosaic.version = 11 : i64} {
  func.func @_ws_kernel(%arg0: memref<147x64xf32, #tpu.memory_space<vmem>>, %arg1: memref<147x64xf32, #tpu.memory_space<vmem>>) attributes {dimension_semantics = [], scalar_prefetch = 0 : i64, scratch_operands = 0 : i64, tpu.core_type = #tpu.core_type<tc>} {
    %c0 = arith.constant 0 : index
    %c0_0 = arith.constant 0 : index
    %0 = vector.load %arg0[%c0, %c0_0] : memref<147x64xf32, #tpu.memory_space<vmem>>, vector<147x64xf32>
    %cst = arith.constant dense<0.000000e+00> : vector<64xf32>
    %1 = vector.multi_reduction <add>, %0, %cst [0] : vector<147x64xf32> to vector<64xf32>
    %2 = vector.shape_cast %1 : vector<64xf32> to vector<1x64xf32>
    %cst_1 = arith.constant 1.470000e+02 : f32
    %3 = vector.broadcast %cst_1 : f32 to vector<1x64xf32>
    %4 = arith.divf %2, %3 : vector<1x64xf32>
    %5 = vector.broadcast %4 : vector<1x64xf32> to vector<147x64xf32>
    %6 = arith.subf %0, %5 : vector<147x64xf32>
    %7 = arith.mulf %6, %6 : vector<147x64xf32>
    %cst_2 = arith.constant dense<0.000000e+00> : vector<64xf32>
    %8 = vector.multi_reduction <add>, %7, %cst_2 [0] : vector<147x64xf32> to vector<64xf32>
    %9 = vector.shape_cast %8 : vector<64xf32> to vector<1x64xf32>
    %cst_3 = arith.constant 1.470000e+02 : f32
    %10 = vector.broadcast %cst_3 : f32 to vector<1x64xf32>
    %11 = arith.divf %9, %10 : vector<1x64xf32>
    %12 = vector.broadcast %4 : vector<1x64xf32> to vector<147x64xf32>
    %13 = arith.subf %0, %12 : vector<147x64xf32>
    %cst_4 = arith.constant 9.99999993E-9 : f32
    %14 = vector.broadcast %cst_4 : f32 to vector<1x64xf32>
    %15 = arith.addf %11, %14 : vector<1x64xf32>
    %16 = math.rsqrt %15 : vector<1x64xf32>
    %17 = vector.broadcast %16 : vector<1x64xf32> to vector<147x64xf32>
    %18 = arith.mulf %13, %17 : vector<147x64xf32>
    %c0_5 = arith.constant 0 : index
    %c0_6 = arith.constant 0 : index
    %19 = vector.load %arg1[%c0_5, %c0_6] : memref<147x64xf32, #tpu.memory_space<vmem>>, vector<147x64xf32>
    tpu.vector_store %arg1[%c0_5, %c0_6], %18 {strides = array<i32>} : memref<147x64xf32, #tpu.memory_space<vmem>>, vector<147x64xf32>,
    return
  }
}

</mosaic_0001>

<bundles_post_ra>
// kernel: tpu_custom_call.1
= control target key start
LH: loop header
LB: loop body
LE: loop exit
PB: predicated region body
PF: predicated region fallthrough
CT: control target
= control target key end

     0   :  { %vm27_vm0 = vcmask 523264   ;;  %vm63_vm1 = vcmask 518144   ;;  %s522_s0 = inlined_call_operand.vmem [shape: f32[147,64], index: 0, kind: input, shape index: {}]   ;;  %s523_s1 = inlined_call_operand.vmem [shape: f32[147,64], index: 1, kind: output, shape index: {}]  }
   0x1   :  { %v215_v0 = vld [vmem:[%s522_s0] sm:$0xff]  ;;  %v220_v1 = vld [vmem:[%s522_s0 + $0x8] sm:$0xff]  ;;  %v225_v2 = vld [vmem:[%s522_s0 + $0x10] sm:$0xff] }
   0x2   :  { %v230_v3 = vld [vmem:[%s522_s0 + $0x18] sm:$0xff]  ;;  %v28_v4 = vsel %vm27_vm0, %v215_v0, 0.0  ;;  %v29_v5 = vsel %vm27_vm0, %v220_v1, 0.0  ;;  %v31_v6 = vsel %vm27_vm0, %v225_v2, 0.0  ;;  %v12_v7 = vld [vmem:[%s522_s0 + $0x20] sm:$0xff]  ;;  %v13_v10 = vld [vmem:[%s522_s0 + $0x28] sm:$0xff] }
   0x3   :  { %v30_v8 = vadd.f32 %v29_v5, %v28_v4  ;;  %v33_v9 = vsel %vm27_vm0, %v230_v3, 0.0  ;;  %v35_v12 = vsel %vm27_vm0, %v12_v7, 0.0  ;;  %v14_v13 = vld [vmem:[%s522_s0 + $0x30] sm:$0xff]  ;;  %v37_v15 = vsel %vm27_vm0, %v13_v10, 0.0  ;;  %v254_v16 = vld [vmem:[%s522_s0 + $0x38] sm:$0xff]  ;;  %v260_v19 = vld [vmem:[%s522_s0 + $0x40] sm:$0xff] }
   0x4   :  { %v39_v18 = vsel %vm27_vm0, %v14_v13, 0.0  ;;  %v41_v21 = vsel %vm27_vm0, %v254_v16, 0.0  ;;  %v267_v22 = vld [vmem:[%s522_s0 + $0x48] sm:$0xff]  ;;  %v43_v24 = vsel %vm27_vm0, %v260_v19, 0.0  ;;  %v274_v25 = vld [vmem:[%s522_s0 + $0x50] sm:$0xff]  ;;  %v281_v28 = vld [vmem:[%s522_s0 + $0x58] sm:$0xff] }
   0x5   :  { %v32_v11 = vadd.f32 %v31_v6, %v30_v8  ;;  %v45_v27 = vsel %vm27_vm0, %v267_v22, 0.0  ;;  %v47_v30 = vsel %vm27_vm0, %v274_v25, 0.0  ;;  %v288_v31 = vld [vmem:[%s522_s0 + $0x60] sm:$0xff]  ;;  %v49_v33 = vsel %vm27_vm0, %v281_v28, 0.0  ;;  %v295_v34 = vld [vmem:[%s522_s0 + $0x68] sm:$0xff]  ;;  %v302_v37 = vld [vmem:[%s522_s0 + $0x70] sm:$0xff] }
   0x6   :  { %v51_v36 = vsel %vm27_vm0, %v288_v31, 0.0  ;;  %v53_v39 = vsel %vm27_vm0, %v295_v34, 0.0  ;;  %v309_v40 = vld [vmem:[%s522_s0 + $0x78] sm:$0xff]  ;;  %v55_v42 = vsel %vm27_vm0, %v302_v37, 0.0  ;;  %v316_v43 = vld [vmem:[%s522_s0 + $0x80] sm:$0xff]  ;;  %v323_v46 = vld [vmem:[%s522_s0 + $0x88] sm:$0xff] }
   0x7   :  { %v34_v14 = vadd.f32 %v33_v9, %v32_v11  ;;  %v57_v45 = vsel %vm27_vm0, %v309_v40, 0.0  ;;  %v59_v48 = vsel %vm27_vm0, %v316_v43, 0.0  ;;  %v330_v49 = vld [vmem:[%s522_s0 + $0x90] sm:$0x7]  ;;  %v61_v51 = vsel %vm27_vm0, %v323_v46, 0.0 }
   0x8   :  { %v64_v53 = vsel %vm63_vm1, %v330_v49, 0.0 }
   0x9   :  { %v36_v17 = vadd.f32 %v35_v12, %v34_v14 }
   0xb   :  { %v38_v20 = vadd.f32 %v37_v15, %v36_v17 }
   0xd   :  { %v40_v23 = vadd.f32 %v39_v18, %v38_v20 }
   0xf   :  { %v42_v26 = vadd.f32 %v41_v21, %v40_v23 }
  0x11   :  { %v44_v29 = vadd.f32 %v43_v24, %v42_v26 }
  0x13   :  { %v46_v32 = vadd.f32 %v45_v27, %v44_v29 }
  0x15   :  { %v48_v35 = vadd.f32 %v47_v30, %v46_v32 }
  0x17   :  { %v50_v38 = vadd.f32 %v49_v33, %v48_v35 }
  0x19   :  { %v52_v41 = vadd.f32 %v51_v36, %v50_v38 }
  0x1b   :  { %v54_v44 = vadd.f32 %v53_v39, %v52_v41 }
  0x1d   :  { %v56_v47 = vadd.f32 %v55_v42, %v54_v44 }
  0x1f   :  { %v58_v50 = vadd.f32 %v57_v45, %v56_v47 }
  0x21   :  { %v60_v52 = vadd.f32 %v59_v48, %v58_v50 }
  0x23   :  { %v62_v54 = vadd.f32 %v61_v51, %v60_v52 }
  0x25   :  { %v65_v55 = vadd.f32 %v64_v53, %v62_v54 }
  0x27   :  { %v66_v56 = vrot.slane %v65_v55, 4 }
  0x29   :  { %v67_v57 = vadd.f32 %v66_v56, %v65_v55 }
  0x2b   :  { %v68_v58 = vrot.slane %v67_v57, 2 }
  0x2d   :  { %v69_v59 = vadd.f32 %v68_v58, %v67_v57 }
  0x2f   :  { %v70_v60 = vrot.slane %v69_v59, 1 }
  0x31   :  { %v71_v61 = vadd.f32 %v70_v60, %v69_v59 }
  0x33   :  { %v73_v62 = vmul.f32 0.006802721, %v71_v61 }
  0x35   :  { %v337_v63 = vsub.f32 %v215_v0, %v73_v62  ;;  %v340_v4 = vsub.f32 %v220_v1, %v73_v62  ;;  %v343_v5 = vsub.f32 %v225_v2, %v73_v62  ;;  %v346_v6 = vsub.f32 %v230_v3, %v73_v62 }
  0x36   :  { %v348_v8 = vsub.f32 %v12_v7, %v73_v62  ;;  %v356_v12 = vsub.f32 %v13_v10, %v73_v62  ;;  %v360_v2 = vsub.f32 %v14_v13, %v73_v62  ;;  %v368_v18 = vsub.f32 %v254_v16, %v73_v62 }
  0x37   :  { %v93_v9 = vmul.f32 %v337_v63, %v337_v63  ;;  %v94_v11 = vmul.f32 %v340_v4, %v340_v4  ;;  %v95_v0 = vmul.f32 %v343_v5, %v343_v5  ;;  %v96_v1 = vmul.f32 %v346_v6, %v346_v6 }
  0x38   :  { %v97_v3 = vmul.f32 %v348_v8, %v348_v8  ;;  %v98_v10 = vmul.f32 %v356_v12, %v356_v12  ;;  %v374_v21 = vsub.f32 %v260_v19, %v73_v62  ;;  %v99_v23 = vmul.f32 %v360_v2, %v360_v2 }
  0x39   :  { %v112_v7 = vsel %vm27_vm0, %v93_v9, 0.0  ;;  %v113_v14 = vsel %vm27_vm0, %v94_v11, 0.0  ;;  %v115_v17 = vsel %vm27_vm0, %v95_v0, 0.0  ;;  %v117_v20 = vsel %vm27_vm0, %v96_v1, 0.0 }
  0x3a   :  { %v114_v15 = vadd.f32 %v113_v14, %v112_v7  ;;  %v119_v24 = vsel %vm27_vm0, %v97_v3, 0.0  ;;  %v380_v27 = vsub.f32 %v267_v22, %v73_v62  ;;  %v100_v16 = vmul.f32 %v368_v18, %v368_v18 }
  0x3b   :  { %v121_v29 = vsel %vm27_vm0, %v98_v10, 0.0  ;;  %v386_v32 = vsub.f32 %v274_v25, %v73_v62  ;;  %v101_v19 = vmul.f32 %v374_v21, %v374_v21  ;;  %v123_v33 = vsel %vm27_vm0, %v99_v23, 0.0 }
  0x3c   :  { %v116_v13 = vadd.f32 %v115_v17, %v114_v15  ;;  %v392_v36 = vsub.f32 %v281_v28, %v73_v62  ;;  %v102_v22 = vmul.f32 %v380_v27, %v380_v27  ;;  %v125_v38 = vsel %vm27_vm0, %v100_v16, 0.0 }
  0x3d   :  { %v398_v41 = vsub.f32 %v288_v31, %v73_v62  ;;  %v103_v25 = vmul.f32 %v386_v32, %v386_v32  ;;  %v127_v42 = vsel %vm27_vm0, %v101_v19, 0.0  ;;  %v404_v45 = vsub.f32 %v295_v34, %v73_v62 }
  0x3e   :  { %v118_v26 = vadd.f32 %v117_v20, %v116_v13  ;;  %v104_v28 = vmul.f32 %v392_v36, %v392_v36  ;;  %v129_v47 = vsel %vm27_vm0, %v102_v22, 0.0  ;;  %v410_v50 = vsub.f32 %v302_v37, %v73_v62 }
  0x3f   :  { %v105_v31 = vmul.f32 %v398_v41, %v398_v41  ;;  %v131_v51 = vsel %vm27_vm0, %v103_v25, 0.0  ;;  %v89_v53 = vsub.f32 %v309_v40, %v73_v62  ;;  %v106_v34 = vmul.f32 %v404_v45, %v404_v45 }
  0x40   :  { %v120_v30 = vadd.f32 %v119_v24, %v118_v26  ;;  %v133_v54 = vsel %vm27_vm0, %v104_v28, 0.0  ;;  %v90_v56 = vsub.f32 %v316_v43, %v73_v62  ;;  %v107_v37 = vmul.f32 %v410_v50, %v410_v50 }
  0x41   :  { %v135_v57 = vsel %vm27_vm0, %v105_v31, 0.0  ;;  %v91_v59 = vsub.f32 %v323_v46, %v73_v62  ;;  %v108_v60 = vmul.f32 %v89_v53, %v89_v53  ;;  %v137_v61 = vsel %vm27_vm0, %v106_v34, 0.0 }
  0x42   :  { %v122_v35 = vadd.f32 %v121_v29, %v120_v30  ;;  %v92_v9 = vsub.f32 %v330_v49, %v73_v62  ;;  %v109_v11 = vmul.f32 %v90_v56, %v90_v56  ;;  %v139_v0 = vsel %vm27_vm0, %v107_v37, 0.0 }
  0x43   :  { %v110_v3 = vmul.f32 %v91_v59, %v91_v59  ;;  %v141_v43 = vsel %vm27_vm0, %v108_v60, 0.0 }
  0x44   :  { %v124_v39 = vadd.f32 %v123_v33, %v122_v35  ;;  %v111_v14 = vmul.f32 %v92_v9, %v92_v9  ;;  %v143_v15 = vsel %vm27_vm0, %v109_v11, 0.0 }
  0x45   :  { %v145_v46 = vsel %vm27_vm0, %v110_v3, 0.0 }
  0x46   :  { %v126_v44 = vadd.f32 %v125_v38, %v124_v39  ;;  %v147_v20 = vsel %vm63_vm1, %v111_v14, 0.0 }
  0x48   :  { %v128_v48 = vadd.f32 %v127_v42, %v126_v44 }
  0x4a   :  { %v130_v52 = vadd.f32 %v129_v47, %v128_v48 }
  0x4c   :  { %v132_v55 = vadd.f32 %v131_v51, %v130_v52 }
  0x4e   :  { %v134_v58 = vadd.f32 %v133_v54, %v132_v55 }
  0x50   :  { %v136_v40 = vadd.f32 %v135_v57, %v134_v58 }
  0x52   :  { %v138_v1 = vadd.f32 %v137_v61, %v136_v40 }
  0x54   :  { %v140_v7 = vadd.f32 %v139_v0, %v138_v1 }
  0x56   :  { %v142_v17 = vadd.f32 %v141_v43, %v140_v7 }
  0x58   :  { %v144_v10 = vadd.f32 %v143_v15, %v142_v17 }
  0x5a   :  { %v146_v13 = vadd.f32 %v145_v46, %v144_v10 }
  0x5c   :  { %v148_v23 = vadd.f32 %v147_v20, %v146_v13 }
  0x5e   :  { %v149_v49 = vrot.slane %v148_v23, 4 }
  0x60   :  { %v150_v62 = vadd.f32 %v149_v49, %v148_v23 }
  0x62   :  { %v151_v24 = vrot.slane %v150_v62, 2 }
  0x64   :  { %v152_v26 = vadd.f32 %v151_v24, %v150_v62 }
  0x66   :  { %v153_v16 = vrot.slane %v152_v26, 1 }
  0x68   :  { %v154_v29 = vadd.f32 %v153_v16, %v152_v26 }
  0x6a   :  { %v155_v30 = vmul.f32 0.006802721, %v154_v29 }
  0x6c   :  { %v156_v19 = vadd.f32 1e-08, %v155_v30 }
  0x6e   :  { %200 = vrsqrt.f32 %v156_v19 }
  0x7b   :  { %v201_v33 = vpop.eup %200 }
  0x7c   :  { %v158_v35 = vmul.f32 %v201_v33, %v337_v63  ;;  %v159_v22 = vmul.f32 %v201_v33, %v340_v4  ;;  %v160_v38 = vmul.f32 %v201_v33, %v343_v5  ;;  %v161_v39 = vmul.f32 %v201_v33, %v346_v6 }
  0x7d   :  { %v162_v25 = vmul.f32 %v201_v33, %v348_v8  ;;  %v163_v42 = vmul.f32 %v201_v33, %v356_v12  ;;  %v164_v44 = vmul.f32 %v201_v33, %v360_v2  ;;  %v165_v28 = vmul.f32 %v201_v33, %v368_v18 }
  0x7e   :  { %177 = vst.msk [vmem:[%s523_s1] sm:$0xff] %vm27_vm0, %v158_v35  ;;  %178 = vst.msk [vmem:[%s523_s1 + $0x8] sm:$0xff] %vm27_vm0, %v159_v22  ;;  %v166_v63 = vmul.f32 %v201_v33, %v374_v21  ;;  %v167_v4 = vmul.f32 %v201_v33, %v380_v27  ;;  %v168_v5 = vmul.f32 %v201_v33, %v386_v32 }
  0x7f   :  { %179 = vst.msk [vmem:[%s523_s1 + $0x10] sm:$0xff] %vm27_vm0, %v160_v38  ;;  %180 = vst.msk [vmem:[%s523_s1 + $0x18] sm:$0xff] %vm27_vm0, %v161_v39  ;;  %v169_v6 = vmul.f32 %v201_v33, %v392_v36  ;;  %v170_v8 = vmul.f32 %v201_v33, %v398_v41  ;;  %v171_v12 = vmul.f32 %v201_v33, %v404_v45 }
  0x80   :  { %181 = vst.msk [vmem:[%s523_s1 + $0x20] sm:$0xff] %vm27_vm0, %v162_v25  ;;  %182 = vst.msk [vmem:[%s523_s1 + $0x28] sm:$0xff] %vm27_vm0, %v163_v42  ;;  %v172_v2 = vmul.f32 %v201_v33, %v410_v50  ;;  %v173_v18 = vmul.f32 %v201_v33, %v89_v53  ;;  %v174_v21 = vmul.f32 %v201_v33, %v90_v56 }
  0x81   :  { %183 = vst.msk [vmem:[%s523_s1 + $0x30] sm:$0xff] %vm27_vm0, %v164_v44  ;;  %184 = vst.msk [vmem:[%s523_s1 + $0x38] sm:$0xff] %vm27_vm0, %v165_v28  ;;  %v175_v27 = vmul.f32 %v201_v33, %v91_v59  ;;  %v176_v32 = vmul.f32 %v201_v33, %v92_v9 }
  0x82   :  { %185 = vst.msk [vmem:[%s523_s1 + $0x40] sm:$0xff] %vm27_vm0, %v166_v63  ;;  %186 = vst.msk [vmem:[%s523_s1 + $0x48] sm:$0xff] %vm27_vm0, %v167_v4 }
  0x83   :  { %187 = vst.msk [vmem:[%s523_s1 + $0x50] sm:$0xff] %vm27_vm0, %v168_v5  ;;  %188 = vst.msk [vmem:[%s523_s1 + $0x58] sm:$0xff] %vm27_vm0, %v169_v6 }
  0x84   :  { %189 = vst.msk [vmem:[%s523_s1 + $0x60] sm:$0xff] %vm27_vm0, %v170_v8  ;;  %190 = vst.msk [vmem:[%s523_s1 + $0x68] sm:$0xff] %vm27_vm0, %v171_v12 }
  0x85   :  { %191 = vst.msk [vmem:[%s523_s1 + $0x70] sm:$0xff] %vm27_vm0, %v172_v2  ;;  %192 = vst.msk [vmem:[%s523_s1 + $0x78] sm:$0xff] %vm27_vm0, %v173_v18 }
  0x86   :  { %193 = vst.msk [vmem:[%s523_s1 + $0x80] sm:$0xff] %vm27_vm0, %v174_v21  ;;  %194 = vst.msk [vmem:[%s523_s1 + $0x88] sm:$0xff] %vm27_vm0, %v175_v27 }
  0x87   :  { %195 = vst.msk [vmem:[%s523_s1 + $0x90] sm:$0x7] %vm63_vm1, %v176_v32 }

</bundles_post_ra>
